<compile_context>
chip_gen: v7x
topology: tpu7x:2x2x1
jax: 0.10.0
libtpu: 0.0.40
codegen_flags: <defaults>
</compile_context>

<pallas_src>
import functools
import numpy as np
import jax
import jax.numpy as jnp
from jax.experimental import pallas as pl
from jax.experimental.pallas import tpu as pltpu


def _round_up(v, m):
    return ((v + m - 1) // m) * m


# ----------------------------- Pallas kernels -------------------------------

def _matmul_kernel(*refs, relu, add_res):
    if add_res:
        a_ref, b_ref, bias_ref, res_ref, o_ref, acc_ref = refs
    else:
        a_ref, b_ref, bias_ref, o_ref, acc_ref = refs
        res_ref = None
    k = pl.program_id(2)

    @pl.when(k == 0)
    def _():
        acc_ref[...] = jnp.zeros_like(acc_ref)

    acc_ref[...] += jnp.dot(a_ref[...], b_ref[...],
                            preferred_element_type=jnp.float32)

    @pl.when(k == pl.num_programs(2) - 1)
    def _():
        out = acc_ref[...] + bias_ref[...]
        if add_res:
            out = out + res_ref[...].astype(jnp.float32)
        if relu:
            out = jnp.maximum(out, 0.0)
        o_ref[...] = out.astype(o_ref.dtype)


@functools.partial(jax.jit, static_argnames=("n_out", "relu", "out_dtype"))
def matmul_bias_act(a, b_p, bias_p, residual=None, *, n_out, relu=False,
                    out_dtype=jnp.bfloat16):
    """(M,K) @ pre-packed bf16 (Kp,Np) + f32 bias (+residual, +ReLU) on the MXU."""
    M, K = a.shape
    Kp, Np = b_p.shape
    tk = 256 if Kp % 256 == 0 else 128
    tn = 256 if Np % 256 == 0 else 128
    tm = min(256, _round_up(M, 16))
    Mp = _round_up(M, tm)

    a_p = jnp.pad(a.astype(jnp.bfloat16), ((0, Mp - M), (0, Kp - K)))
    args = [a_p, b_p, bias_p]
    in_specs = [
        pl.BlockSpec((tm, tk), lambda m, n, k: (m, k)),
        pl.BlockSpec((tk, tn), lambda m, n, k: (k, n)),
        pl.BlockSpec((1, tn), lambda m, n, k: (0, n)),
    ]
    add_res = residual is not None
    if add_res:
        r = residual
        r_p = jnp.pad(r.astype(jnp.bfloat16),
                      ((0, Mp - r.shape[0]), (0, Np - r.shape[1])))
        args.append(r_p)
        in_specs.append(pl.BlockSpec((tm, tn), lambda m, n, k: (m, n)))

    grid = (Mp // tm, Np // tn, Kp // tk)      # reduction (K) axis last
    out = pl.pallas_call(
        functools.partial(_matmul_kernel, relu=relu, add_res=add_res),
        out_shape=jax.ShapeDtypeStruct((Mp, Np), out_dtype),
        grid_spec=pltpu.PrefetchScalarGridSpec(
            num_scalar_prefetch=0,
            grid=grid,
            in_specs=in_specs,
            out_specs=pl.BlockSpec((tm, tn), lambda m, n, k: (m, n)),
            scratch_shapes=[pltpu.VMEM((tm, tn), jnp.float32)],
        ),
        compiler_params=pltpu.CompilerParams(
            dimension_semantics=("parallel", "parallel", "arbitrary")),
    )(*args)
    return out[:M, :n_out]


def _maxpool_kernel(*refs):
    o_ref = refs[-1]
    m = refs[0][...]
    for r in refs[1:-1]:
        m = jnp.maximum(m, r[...])
    o_ref[...] = m


def _chan_stats_kernel(x_ref, mean_ref, max_ref):
    x = x_ref[...].astype(jnp.float32)
    mean_ref[...] = jnp.mean(x, axis=-1, keepdims=True)
    max_ref[...] = jnp.max(x, axis=-1, keepdims=True)


@jax.jit
def channel_stats(x2d):
    M, C = x2d.shape
    tm = min(256, _round_up(M, 16))
    Mp = _round_up(M, tm)
    xp = jnp.pad(x2d, ((0, Mp - M), (0, 0)))
    mean, mx = pl.pallas_call(
        _chan_stats_kernel,
        out_shape=(jax.ShapeDtypeStruct((Mp, 1), jnp.float32),
                   jax.ShapeDtypeStruct((Mp, 1), jnp.float32)),
        grid_spec=pltpu.PrefetchScalarGridSpec(
            num_scalar_prefetch=0, grid=(Mp // tm,),
            in_specs=[pl.BlockSpec((tm, C), lambda i: (i, 0))],
            out_specs=(pl.BlockSpec((tm, 1), lambda i: (i, 0)),
                       pl.BlockSpec((tm, 1), lambda i: (i, 0)))),
        compiler_params=pltpu.CompilerParams(
            dimension_semantics=("parallel",)),
    )(xp)
    return mean[:M], mx[:M]


def _gap_kernel(x_ref, o_ref):
    o_ref[...] = jnp.mean(x_ref[...].astype(jnp.float32), axis=1, keepdims=True)


@jax.jit
def gap_pool(x3d):
    n, s, c = x3d.shape
    out = pl.pallas_call(
        _gap_kernel,
        out_shape=jax.ShapeDtypeStruct((n, 1, c), jnp.float32),
        grid_spec=pltpu.PrefetchScalarGridSpec(
            num_scalar_prefetch=0, grid=(n,),
            in_specs=[pl.BlockSpec((1, s, c), lambda i: (i, 0, 0))],
            out_specs=pl.BlockSpec((1, 1, c), lambda i: (i, 0, 0))),
        compiler_params=pltpu.CompilerParams(
            dimension_semantics=("parallel",)),
    )(x3d)
    return out.reshape(n, c)


def _att_kernel(x_ref, sa_ref, eca_ref, sa_o, eca_o):
    x = x_ref[...].astype(jnp.float32)
    sa_o[...] = (x * jax.nn.sigmoid(sa_ref[...])).astype(sa_o.dtype)
    eca_o[...] = (x * jax.nn.sigmoid(eca_ref[...])).astype(eca_o.dtype)


@jax.jit
def apply_attention(x2d, sa_logit, eca_logit):
    """sa = x*sigmoid(sa_logit) (per-pixel), eca = x*sigmoid(eca_logit) (per-chan)."""
    M, C = x2d.shape
    tm = min(256, _round_up(M, 16))
    Mp = _round_up(M, tm)
    xp = jnp.pad(x2d, ((0, Mp - M), (0, 0)))
    sap = jnp.pad(sa_logit.astype(jnp.float32), ((0, Mp - M), (0, 0)))
    ecap = jnp.pad(eca_logit.astype(jnp.float32), ((0, Mp - M), (0, 0)))
    sa_o, eca_o = pl.pallas_call(
        _att_kernel,
        out_shape=(jax.ShapeDtypeStruct((Mp, C), x2d.dtype),
                   jax.ShapeDtypeStruct((Mp, C), x2d.dtype)),
        grid_spec=pltpu.PrefetchScalarGridSpec(
            num_scalar_prefetch=0, grid=(Mp // tm,),
            in_specs=[pl.BlockSpec((tm, C), lambda i: (i, 0)),
                      pl.BlockSpec((tm, 1), lambda i: (i, 0)),
                      pl.BlockSpec((tm, C), lambda i: (i, 0))],
            out_specs=(pl.BlockSpec((tm, C), lambda i: (i, 0)),
                       pl.BlockSpec((tm, C), lambda i: (i, 0)))),
        compiler_params=pltpu.CompilerParams(
            dimension_semantics=("parallel",)),
    )(xp, sap, ecap)
    return sa_o[:M], eca_o[:M]


# ---------------------------- conv / pool glue -------------------------------

def _im2col(x, kh, kw, stride, pad):
    n, h, w, c = x.shape
    xp = jnp.pad(x, ((0, 0), (pad, pad), (pad, pad), (0, 0)))
    ho = (h + 2 * pad - kh) // stride + 1
    wo = (w + 2 * pad - kw) // stride + 1
    cols = []
    for i in range(kh):
        for j in range(kw):
            cols.append(xp[:, i:i + stride * ho:stride,
                           j:j + stride * wo:stride, :])
    cols = jnp.concatenate(cols, axis=-1)          # (n, ho, wo, kh*kw*c)
    return cols.reshape(n * ho * wo, kh * kw * c), (n, ho, wo)


@functools.partial(jax.jit, static_argnames=("cout", "kh", "kw", "stride",
                                             "pad", "relu", "out_dtype"))
def conv2d(x, w_p, bias_p, *, cout, kh, kw, stride, pad, relu,
           residual=None, out_dtype=jnp.bfloat16):
    n, h, w, cin = x.shape
    if kh == 1 and kw == 1 and pad == 0:
        if stride > 1:
            x = x[:, ::stride, ::stride, :]
        n, ho, wo, _ = x.shape
        cols = x.reshape(n * ho * wo, cin)
    else:
        cols, (n, ho, wo) = _im2col(x, kh, kw, stride, pad)
    res2d = residual.reshape(-1, cout) if residual is not None else None
    y = matmul_bias_act(cols, w_p, bias_p, res2d, n_out=cout, relu=relu,
                        out_dtype=out_dtype)
    return y.reshape(n, ho, wo, cout)


@jax.jit
def maxpool_3x3_s2_p1(x):
    n, h, w, c = x.shape
    xp = jnp.pad(x, ((0, 0), (1, 1), (1, 1), (0, 0)),
                 constant_values=-jnp.inf)
    ho = (h + 2 - 3) // 2 + 1
    wo = (w + 2 - 3) // 2 + 1
    M = n * ho * wo
    tm = min(256, _round_up(M, 16))
    Mp = _round_up(M, tm)
    slices = []
    for i in range(3):
        for j in range(3):
            s = xp[:, i:i + 2 * ho:2, j:j + 2 * wo:2, :].reshape(M, c)
            slices.append(jnp.pad(s, ((0, Mp - M), (0, 0))))
    out = pl.pallas_call(
        _maxpool_kernel,
        out_shape=jax.ShapeDtypeStruct((Mp, c), x.dtype),
        grid_spec=pltpu.PrefetchScalarGridSpec(
            num_scalar_prefetch=0, grid=(Mp // tm,),
            in_specs=[pl.BlockSpec((tm, c), lambda i: (i, 0))
                      for _ in range(9)],
            out_specs=pl.BlockSpec((tm, c), lambda i: (i, 0))),
        compiler_params=pltpu.CompilerParams(
            dimension_semantics=("parallel",)),
    )(*slices)
    return out[:M].reshape(n, ho, wo, c)


# --------------------------- deterministic params ----------------------------

class _ParamGen:
    def __init__(self, seed=0):
        self.key = jax.random.PRNGKey(seed)
        self.i = 0

    def normal(self, shape, std):
        self.i += 1
        k = jax.random.fold_in(self.key, self.i)
        return jax.random.normal(k, shape, jnp.float32) * jnp.float32(std)


PG = _ParamGen(0)
_BN_EPS = 1e-5


def conv_bn_params(cin, cout, k):
    # He-init conv (bias=False) + BatchNorm2d (default init / running stats)
    # folded into an exact affine conv weight + bias (eval-mode BN).
    fan_in = cin * k * k
    w = PG.normal((cout, cin, k, k), np.sqrt(2.0 / fan_in))
    gamma = jnp.ones((cout,), jnp.float32)
    beta = jnp.zeros((cout,), jnp.float32)
    r_mean = jnp.zeros((cout,), jnp.float32)
    r_var = jnp.ones((cout,), jnp.float32)
    scale = gamma / jnp.sqrt(r_var + _BN_EPS)
    return w * scale[:, None, None, None], beta - r_mean * scale


def pack_matmul_weight(wmat, bias):
    """(K,N) f32 weight + (N,) f32 bias -> bf16 (Kp,Np) + f32 (1,Np), padded once."""
    K, N = wmat.shape
    Kp = _round_up(K, 128)
    Np = _round_up(N, 128)
    w_p = jnp.pad(wmat, ((0, Kp - K), (0, Np - N))).astype(jnp.bfloat16)
    b_p = jnp.pad(bias, (0, Np - N)).astype(jnp.float32).reshape(1, Np)
    return w_p, b_p


def pack_conv(w_oihw, bias):
    cout, cin, kh, kw = w_oihw.shape
    wmat = jnp.transpose(w_oihw, (2, 3, 1, 0)).reshape(kh * kw * cin, cout)
    return pack_matmul_weight(wmat, bias)


def make_bottleneck(cin, planes, downsample):
    p = {'c1': pack_conv(*conv_bn_params(cin, planes, 1)),
         'c2': pack_conv(*conv_bn_params(planes, planes, 3)),
         'c3': pack_conv(*conv_bn_params(planes, planes * 4, 1))}
    if downsample:
        p['ds'] = pack_conv(*conv_bn_params(cin, planes * 4, 1))
    return p


def build_params():
    p = {}
    p['conv1'] = pack_conv(*conv_bn_params(3, 64, 7))
    # ResNet-101: [3, 4, 23, 3]
    p['layer1'] = [make_bottleneck(64, 64, True)] + \
                  [make_bottleneck(256, 64, False) for _ in range(2)]
    p['layer2'] = [make_bottleneck(256, 128, True)] + \
                  [make_bottleneck(512, 128, False) for _ in range(3)]
    p['layer3'] = [make_bottleneck(512, 256, True)] + \
                  [make_bottleneck(1024, 256, False) for _ in range(22)]
    p['layer4'] = [make_bottleneck(1024, 512, True)] + \
                  [make_bottleneck(2048, 512, False) for _ in range(2)]
    # SpatialAttention: Conv2d(2, 1, 7, padding=3, bias=False)
    p['sa'] = pack_conv(PG.normal((1, 2, 7, 7), np.sqrt(2.0 / (2 * 49))),
                        jnp.zeros((1,), jnp.float32))
    # eca_layer(512): Conv1d(1, 1, k=3, padding=1, bias=False)
    p['eca'] = PG.normal((3,), 1.0 / np.sqrt(3.0))
    # pool: Conv2d(2048*3, 512, 3, 1, 1) + bias, ReLU, AdaptiveAvgPool2d(1)
    fan_in = 2048 * 3 * 9
    p['pool'] = pack_conv(PG.normal((512, 2048 * 3, 3, 3), np.sqrt(2.0 / fan_in)),
                          PG.normal((512,), 1.0 / np.sqrt(fan_in)))
    # classifier: Linear(512, 172)
    p['fc'] = pack_matmul_weight(PG.normal((512, 172), 1.0 / np.sqrt(512.0)),
                                 PG.normal((172,), 1.0 / np.sqrt(512.0)))
    return p


# -------------------------------- forward ------------------------------------

def bottleneck_forward(x, bp, planes, stride):
    out = conv2d(x, *bp['c1'], cout=planes, kh=1, kw=1, stride=1, pad=0,
                 relu=True)
    out = conv2d(out, *bp['c2'], cout=planes, kh=3, kw=3, stride=stride, pad=1,
                 relu=True)
    if 'ds' in bp:
        idt = conv2d(x, *bp['ds'], cout=planes * 4, kh=1, kw=1, stride=stride,
                     pad=0, relu=False)
    else:
        idt = x
    # residual add + ReLU fused into the 3rd conv's matmul epilogue
    return conv2d(out, *bp['c3'], cout=planes * 4, kh=1, kw=1, stride=1, pad=0,
                  relu=True, residual=idt)


def my_resnet_forward(x_nchw, params):
    x = jnp.transpose(x_nchw, (0, 2, 3, 1)).astype(jnp.bfloat16)  # NCHW -> NHWC
    x = conv2d(x, *params['conv1'], cout=64, kh=7, kw=7, stride=2, pad=3,
               relu=True)
    x = maxpool_3x3_s2_p1(x)
    for lname, planes, stride in (('layer1', 64, 1), ('layer2', 128, 2),
                                  ('layer3', 256, 2), ('layer4', 512, 2)):
        for bi, bp in enumerate(params[lname]):
            x = bottleneck_forward(x, bp, planes, stride if bi == 0 else 1)

    n, h, w, c = x.shape                              # (N, 2, 2, 2048)
    M = n * h * w
    x2d = x.reshape(M, c)

    # SpatialAttention: sa = x * sigmoid(conv7x7([mean_c(x); max_c(x)]))
    mean_c, max_c = channel_stats(x2d)                # (M, 1) f32 each
    sa_in = jnp.concatenate([mean_c, max_c], axis=-1)
    sa_in = sa_in.astype(jnp.bfloat16).reshape(n, h, w, 2)
    sa_logit = conv2d(sa_in, *params['sa'], cout=1, kh=7, kw=7, stride=1,
                      pad=3, relu=False, out_dtype=jnp.float32).reshape(M, 1)

    # eca_layer: eca = x * sigmoid(conv1d_k3(GAP_hw(x)))
    gap = gap_pool(x.reshape(n, h * w, c))            # (n, c) f32
    wk = params['eca']
    yp = jnp.pad(gap, ((0, 0), (1, 1)))
    eca_logit = wk[0] * yp[:, :-2] + wk[1] * yp[:, 1:-1] + wk[2] * yp[:, 2:]
    eca_full = jnp.broadcast_to(eca_logit[:, None, :],
                                (n, h * w, c)).reshape(M, c)

    sa2d, eca2d = apply_attention(x2d, sa_logit, eca_full)   # bf16 (M, c)

    # att = cat([sa, eca, x], channel) -> pool conv + ReLU + GAP -> classifier
    att = jnp.concatenate([sa2d, eca2d, x2d], axis=-1).reshape(n, h, w, 3 * c)
    pooled = conv2d(att, *params['pool'], cout=512, kh=3, kw=3, stride=1,
                    pad=1, relu=True)
    pooled = gap_pool(pooled.reshape(n, h * w, 512))  # (n, 512) f32
    logits = matmul_bias_act(pooled, params['fc'][0], params['fc'][1],
                             n_out=172, relu=False, out_dtype=jnp.float32)
    return logits                                     # (n, 172)


if __name__ == "__main__":
    params = build_params()
    # Small input consistent with the module: batch=2, RGB, 64x64 spatial
    # (ResNet-101 stride 32 -> 2x2 feature map feeding the attention heads).
    x = jax.random.normal(jax.random.PRNGKey(0), (2, 3, 64, 64), jnp.float32)
    y = my_resnet_forward(x, params)
    y = jax.block_until_ready(y)
    assert y.shape == (2, 172)
    assert bool(jnp.all(jnp.isfinite(y)))
    print("KERNEL_OK")
</pallas_src>

<mosaic_0001>
module attributes {stable_mosaic.version = 11 : i64} {
  func.func @_matmul_kernel(%arg0: i32, %arg1: i32, %arg2: i32, %arg3: memref<256x256xbf16, #tpu.memory_space<vmem>>, %arg4: memref<256x128xbf16, #tpu.memory_space<vmem>>, %arg5: memref<1x128xf32, #tpu.memory_space<vmem>>, %arg6: memref<256x128xbf16, #tpu.memory_space<vmem>>, %arg7: memref<256x128xf32, #tpu.memory_space<vmem>>) attributes {dimension_semantics = [#tpu.dimension_semantics<parallel>, #tpu.dimension_semantics<parallel>, #tpu.dimension_semantics<arbitrary>], iteration_bounds = array<i64: 8, 1, 1>, scalar_prefetch = 0 : i64, scratch_operands = 1 : i64, tpu.core_type = #tpu.core_type<tc>, window_params = [{transform_indices = @transform_0, window_bounds = array<i64: 256, 256>}, {transform_indices = @transform_1, window_bounds = array<i64: 256, 128>}, {transform_indices = @transform_2, window_bounds = array<i64: 1, 128>}, {transform_indices = @transform_3, window_bounds = array<i64: 256, 128>}]} {
    %c0_i32 = arith.constant 0 : i32
    %0 = arith.cmpi eq, %arg2, %c0_i32 : i32
    %1 = arith.extui %0 : i1 to i32
    %c0_i32_0 = arith.constant 0 : i32
    %2 = arith.cmpi ne, %1, %c0_i32_0 : i32
    scf.if %2 {
      %cst_10 = arith.constant 0.000000e+00 : f32
      %12 = vector.broadcast %cst_10 : f32 to vector<256x128xf32>
      %c0_11 = arith.constant 0 : index
      %c0_12 = arith.constant 0 : index
      %13 = vector.load %arg7[%c0_11, %c0_12] : memref<256x128xf32, #tpu.memory_space<vmem>>, vector<256x128xf32>
      tpu.vector_store %arg7[%c0_11, %c0_12], %12 {strides = array<i32>} : memref<256x128xf32, #tpu.memory_space<vmem>>, vector<256x128xf32>,
    } else {
    }
    %c0 = arith.constant 0 : index
    %c0_1 = arith.constant 0 : index
    %3 = vector.load %arg7[%c0, %c0_1] : memref<256x128xf32, #tpu.memory_space<vmem>>, vector<256x128xf32>
    %c0_2 = arith.constant 0 : index
    %c0_3 = arith.constant 0 : index
    %4 = vector.load %arg3[%c0_2, %c0_3] : memref<256x256xbf16, #tpu.memory_space<vmem>>, vector<256x256xbf16>
    %c0_4 = arith.constant 0 : index
    %c0_5 = arith.constant 0 : index
    %5 = vector.load %arg4[%c0_4, %c0_5] : memref<256x128xbf16, #tpu.memory_space<vmem>>, vector<256x128xbf16>
    %cst = arith.constant dense<0.000000e+00> : vector<256x128xf32>
    %6 = tpu.matmul %4, %5, %cst {dimension_numbers = #tpu.dot_dimension_numbers<[1], [0], [0], [1], [0, 0, 1, 1], [], []>} : vector<256x256xbf16>, vector<256x128xbf16>, vector<256x128xf32> -> vector<256x128xf32>
    %7 = arith.addf %3, %6 : vector<256x128xf32>
    %c0_6 = arith.constant 0 : index
    %c0_7 = arith.constant 0 : index
    %8 = vector.load %arg7[%c0_6, %c0_7] : memref<256x128xf32, #tpu.memory_space<vmem>>, vector<256x128xf32>
    tpu.vector_store %arg7[%c0_6, %c0_7], %7 {strides = array<i32>} : memref<256x128xf32, #tpu.memory_space<vmem>>, vector<256x128xf32>,
    %c0_i32_8 = arith.constant 0 : i32
    %9 = arith.cmpi eq, %arg2, %c0_i32_8 : i32
    %10 = arith.extui %9 : i1 to i32
    %c0_i32_9 = arith.constant 0 : i32
    %11 = arith.cmpi ne, %10, %c0_i32_9 : i32
    scf.if %11 {
      %c0_10 = arith.constant 0 : index
      %c0_11 = arith.constant 0 : index
      %12 = vector.load %arg7[%c0_10, %c0_11] : memref<256x128xf32, #tpu.memory_space<vmem>>, vector<256x128xf32>
      %c0_12 = arith.constant 0 : index
      %c0_13 = arith.constant 0 : index
      %13 = vector.load %arg5[%c0_12, %c0_13] : memref<1x128xf32, #tpu.memory_space<vmem>>, vector<1x128xf32>
      %14 = vector.broadcast %13 : vector<1x128xf32> to vector<256x128xf32>
      %15 = arith.addf %12, %14 : vector<256x128xf32>
      %cst_14 = arith.constant 0.000000e+00 : f32
      %16 = vector.broadcast %cst_14 : f32 to vector<256x128xf32>
      %17 = arith.maximumf %15, %16 : vector<256x128xf32>
      %18 = arith.truncf %17 : vector<256x128xf32> to vector<256x128xbf16>
      %c0_15 = arith.constant 0 : index
      %c0_16 = arith.constant 0 : index
      %19 = vector.load %arg6[%c0_15, %c0_16] : memref<256x128xbf16, #tpu.memory_space<vmem>>, vector<256x128xbf16>
      tpu.vector_store %arg6[%c0_15, %c0_16], %18 {strides = array<i32>} : memref<256x128xbf16, #tpu.memory_space<vmem>>, vector<256x128xbf16>,
    } else {
    }
    return
  }
  func.func @transform_0(%arg0: i32, %arg1: i32, %arg2: i32) -> (i32, i32) {
    %c0_i32 = arith.constant 0 : i32
    return %arg0, %arg2 : i32, i32
  }
  func.func @transform_1(%arg0: i32, %arg1: i32, %arg2: i32) -> (i32, i32) {
    %c0_i32 = arith.constant 0 : i32
    return %arg2, %arg1 : i32, i32
  }
  func.func @transform_2(%arg0: i32, %arg1: i32, %arg2: i32) -> (i32, i32) {
    %c0_i32 = arith.constant 0 : i32
    %c0_i32_0 = arith.constant 0 : i32
    return %c0_i32, %arg1 : i32, i32
  }
  func.func @transform_3(%arg0: i32, %arg1: i32, %arg2: i32) -> (i32, i32) {
    %c0_i32 = arith.constant 0 : i32
    return %arg0, %arg1 : i32, i32
  }
}

</mosaic_0001>

<bundles_post_ra>
// kernel: matmul_bias_act.1
= control target key start
LH: loop header
LB: loop body
LE: loop exit
PB: predicated region body
PF: predicated region fallthrough
CT: control target
= control target key end

     0   :  { %s1744_s12 = smov 0   ;;  %s1746_s13 = smov 0   ;;  %s1918_s0 = inlined_call_operand.vmem [shape: bf16[2048,256], index: 0, kind: input, shape index: {}]   ;;  %s1919_s1 = inlined_call_operand.vmem [shape: bf16[256,128], index: 1, kind: input, shape index: {}]   ;;  %s1920_s2 = inlined_call_operand.vmem [shape: f32[1,128], index: 2, kind: input, shape index: {}]   ;;  %s1921_s3 = inlined_call_operand.vmem [shape: bf16[2048,128], index: 3, kind: output, shape index: {}]  }
   0x1   :  { %s1748_s14 = smov 0  }
   0x2 LB: > { %s32_s15 = sadd.s32 1, %s1718_s13  ;;  %p1267_p0 = scmp.ge.s32.totalorder %s1722_s14, 1  ;;  %s1722_s14 = sphi %s1748_s14, %s13_s14   ;;  %s1718_s13 = sphi %s1746_s13, %s1923_s13   ;;  %s1714_s12 = sphi %s1744_s12, %s1922_s12  }
   0x3   : > { %p34_p1 = scmp.ge.s32.totalorder %s32_s15, 8  ;;  %p191_p2 = scmp.lt.s32.totalorder %s1722_s14, 9 }
   0x5   : > { %s1925_s15 = smov (%p34_p1, %s32_s15), 0  ;;  %p192_p3 = pnand %p1267_p0, %p191_p2 }
   0x6   : > { %v1636_v0 = vld [vmem:[%s1919_s1 + $0x40] sm:$0xff] (!%p192_p3)   ;;  %s1268_s18 = sshll.u32 (!%p192_p3), %s1714_s12, 5  ;;  %v1638_v2 = vld [vmem:[%s1919_s1 + $0x48] sm:$0xff] (!%p192_p3)   ;;  %v1640_v4 = vld [vmem:[%s1919_s1 + $0x50] sm:$0xff] (!%p192_p3)  }
   0x7   : > { %195 = sbr.rel (%p192_p3) target bundleno = 320 (0x140), region = 32  ;;  %v1637_v1 = vld [vmem:[%s1919_s1] sm:$0xff] (!%p192_p3)   ;;  %1484 = vmatprep.subr.bf16.mxu0 (!%p192_p3), %v1636_v0  ;;  %1596 = vmatprep.subr.bf16.mxu1 (!%p192_p3), %v1636_v0  ;;  %v1639_v3 = vld [vmem:[%s1919_s1 + $0x8] sm:$0xff] (!%p192_p3)   ;;  %p236_p4 = scmp.lt.s32.totalorder (!%p192_p3), %s1268_s18, 255  ;;  %v1641_v5 = vld [vmem:[%s1919_s1 + $0x10] sm:$0xff] (!%p192_p3)  }
   0x8   : > { %1485 = vmatpush3.bf16.msra.mxu0 (!%p192_p3), %v1637_v1  ;;  %1604 = vmatpush3.bf16.msra.mxu1 (!%p192_p3), %v1637_v1  ;;  %v1642_v6 = vld [vmem:[%s1919_s1 + $0x58] sm:$0xff] (!%p192_p3)   ;;  %v1644_v8 = vld [vmem:[%s1919_s1 + $0x60] sm:$0xff] (!%p192_p3)   ;;  %v1646_v10 = vld [vmem:[%s1919_s1 + $0x68] sm:$0xff] (!%p192_p3)  }
   0x9   : > { %1486 = vmatprep.subr.bf16.mxu0 (!%p192_p3), %v1638_v2  ;;  %1597 = vmatprep.subr.bf16.mxu1 (!%p192_p3), %v1638_v2  ;;  %v1643_v7 = vld [vmem:[%s1919_s1 + $0x18] sm:$0xff] (!%p192_p3)   ;;  %v1645_v9 = vld [vmem:[%s1919_s1 + $0x20] sm:$0xff] (!%p192_p3)   ;;  %v1647_v13 = vld [vmem:[%s1919_s1 + $0x28] sm:$0xff] (!%p192_p3)  }
   0xa   : > { %v1648_v14 = vld [vmem:[%s1919_s1 + $0x70] sm:$0xff] (!%p192_p3)   ;;  %v1650_v16 = vld [vmem:[%s1919_s1 + $0x78] sm:$0xff] (!%p192_p3)   ;;  %v1853_v51 = vld [vmem:[%s1920_s2] ss:$0 sm:$0xff] (!%p192_p3) }
   0xb   : > { %v1649_v15 = vld [vmem:[%s1919_s1 + $0x30] sm:$0xff] (!%p192_p3)   ;;  %v1651_v17 = vld [vmem:[%s1919_s1 + $0x38] sm:$0xff] (!%p192_p3)  }
   0xc   : > { %1487 = vmatpush3.bf16.msra.mxu0 (!%p192_p3), %v1639_v3  ;;  %1605 = vmatpush3.bf16.msra.mxu1 (!%p192_p3), %v1639_v3 }
   0xd   : > { %1488 = vmatprep.subr.bf16.mxu0 (!%p192_p3), %v1640_v4  ;;  %1598 = vmatprep.subr.bf16.mxu1 (!%p192_p3), %v1640_v4 }
   0xe   : > { %s1927_s18 = smov (!%p236_p4, %s1268_s18), 255 }
   0xf   : > { %s1356_s6 = sshll.u32 %s1927_s18, 3  ;;  %s1272_s5 = sshll.u32 %s1927_s18, 2 }
  0x10   : > { %1489 = vmatpush3.bf16.msra.mxu0 %v1641_v5  ;;  %1606 = vmatpush3.bf16.msra.mxu1 %v1641_v5  ;;  %s1795_s11 = scalar_lea.vmem %s1918_s0, %s1356_s6  ;;  %s1863_s8 = scalar_lea.vmem %s1921_s3, %s1272_s5 }
  0x11   : > { %1490 = vmatprep.subr.bf16.mxu0 %v1642_v6  ;;  %1599 = vmatprep.subr.bf16.mxu1 %v1642_v6  ;;  %v1654_v11 = vld [vmem:[%s1795_s11 + $0x4] ss:$8 sps:$4 sm:$0xff]   ;;  %v1652_v18 = vld [vmem:[%s1795_s11] ss:$8 sps:$4 sm:$0xff]   ;;  %v1658_v20 = vld [vmem:[%s1795_s11 + $0x14] ss:$8 sps:$4 sm:$0xff]  }
  0x12   : > { %v1657_v12 = vld [vmem:[%s1795_s11 + $0x84] ss:$8 sps:$4 sm:$0xff]   ;;  %688 = vmatprep.mubr.bf16.mxu0 %v1654_v11  ;;  %v1655_v19 = vld [vmem:[%s1795_s11 + $0x80] ss:$8 sps:$4 sm:$0xff]   ;;  %v1660_v21 = vld [vmem:[%s1795_s11 + $0x94] ss:$8 sps:$4 sm:$0xff]  }
  0x13   : > { %752 = vmatprep.mubr.bf16.mxu1 %v1657_v12  ;;  %v1662_v22 = vld [vmem:[%s1795_s11 + $0x10] ss:$8 sps:$4 sm:$0xff]   ;;  %v1664_v24 = vld [vmem:[%s1795_s11 + $0x24] ss:$8 sps:$4 sm:$0xff]   ;;  %v1668_v26 = vld [vmem:[%s1795_s11 + $0x20] ss:$8 sps:$4 sm:$0xff]  }
  0x14   : > { %1491 = vmatpush3.bf16.msra.mxu0 %v1643_v7  ;;  %1607 = vmatpush3.bf16.msra.mxu1 %v1643_v7  ;;  %v1663_v23 = vld [vmem:[%s1795_s11 + $0x90] ss:$8 sps:$4 sm:$0xff]   ;;  %v1666_v25 = vld [vmem:[%s1795_s11 + $0xa4] ss:$8 sps:$4 sm:$0xff]   ;;  %v1669_v27 = vld [vmem:[%s1795_s11 + $0xa0] ss:$8 sps:$4 sm:$0xff]  }
  0x15   : > { %1492 = vmatprep.subr.bf16.mxu0 %v1644_v8  ;;  %1600 = vmatprep.subr.bf16.mxu1 %v1644_v8  ;;  %v1670_v28 = vld [vmem:[%s1795_s11 + $0x34] ss:$8 sps:$4 sm:$0xff]   ;;  %v1674_v30 = vld [vmem:[%s1795_s11 + $0x30] ss:$8 sps:$4 sm:$0xff]   ;;  %v1676_v32 = vld [vmem:[%s1795_s11 + $0x44] ss:$8 sps:$4 sm:$0xff]  }
  0x16   : > { %v1672_v29 = vld [vmem:[%s1795_s11 + $0xb4] ss:$8 sps:$4 sm:$0xff]   ;;  %v1675_v31 = vld [vmem:[%s1795_s11 + $0xb0] ss:$8 sps:$4 sm:$0xff]   ;;  %v1678_v33 = vld [vmem:[%s1795_s11 + $0xc4] ss:$8 sps:$4 sm:$0xff]  }
  0x17   : > { %v1680_v34 = vld [vmem:[%s1795_s11 + $0x40] ss:$8 sps:$4 sm:$0xff]   ;;  %v1682_v36 = vld [vmem:[%s1795_s11 + $0x54] ss:$8 sps:$4 sm:$0xff]   ;;  %v1686_v38 = vld [vmem:[%s1795_s11 + $0x50] ss:$8 sps:$4 sm:$0xff]  }
  0x18   : > { %1493 = vmatpush3.bf16.msra.mxu0 %v1645_v9  ;;  %1608 = vmatpush3.bf16.msra.mxu1 %v1645_v9  ;;  %v1681_v35 = vld [vmem:[%s1795_s11 + $0xc0] ss:$8 sps:$4 sm:$0xff]   ;;  %v1684_v37 = vld [vmem:[%s1795_s11 + $0xd4] ss:$8 sps:$4 sm:$0xff]   ;;  %v1687_v39 = vld [vmem:[%s1795_s11 + $0xd0] ss:$8 sps:$4 sm:$0xff]  }
  0x19   : > { %1494 = vmatprep.subr.bf16.mxu0 %v1646_v10  ;;  %1601 = vmatprep.subr.bf16.mxu1 %v1646_v10  ;;  %v1688_v40 = vld [vmem:[%s1795_s11 + $0x64] ss:$8 sps:$4 sm:$0xff]   ;;  %v1692_v42 = vld [vmem:[%s1795_s11 + $0x60] ss:$8 sps:$4 sm:$0xff]   ;;  %v1694_v44 = vld [vmem:[%s1795_s11 + $0x74] ss:$8 sps:$4 sm:$0xff]  }
  0x1a   : > { %v1690_v41 = vld [vmem:[%s1795_s11 + $0xe4] ss:$8 sps:$4 sm:$0xff]   ;;  %v1693_v43 = vld [vmem:[%s1795_s11 + $0xe0] ss:$8 sps:$4 sm:$0xff]   ;;  %v1696_v45 = vld [vmem:[%s1795_s11 + $0xf4] ss:$8 sps:$4 sm:$0xff]  }
  0x1b   : > { %v1698_v46 = vld [vmem:[%s1795_s11 + $0x70] ss:$8 sps:$4 sm:$0xff]  }
  0x1c   : > { %1495 = vmatpush3.bf16.msra.mxu0 %v1647_v13  ;;  %1609 = vmatpush3.bf16.msra.mxu1 %v1647_v13  ;;  %v1699_v47 = vld [vmem:[%s1795_s11 + $0xf0] ss:$8 sps:$4 sm:$0xff]  }
  0x1d   : > { %1496 = vmatprep.subr.bf16.mxu0 %v1648_v14  ;;  %1602 = vmatprep.subr.bf16.mxu1 %v1648_v14 }
  0x20   : > { %1497 = vmatpush3.bf16.msra.mxu0 %v1649_v15  ;;  %1610 = vmatpush3.bf16.msra.mxu1 %v1649_v15 }
  0x21   : > { %1498 = vmatprep.subr.bf16.mxu0 %v1650_v16  ;;  %1603 = vmatprep.subr.bf16.mxu1 %v1650_v16 }
  0x24   : > { %1499 = vmatpush3.bf16.msra.mxu0 %v1651_v17  ;;  %1611 = vmatpush3.bf16.msra.mxu1 %v1651_v17 }
  0x27   : > { %689 = vmatmul.mubr.bf16.vlgmr.msra.gmra.mrb[0].mxu0 %v1652_v18  ;;  %753 = vmatmul.mubr.bf16.vlgmr.msra.gmra.mrb[0].mxu1 %v1655_v19 }
  0x28   : > { %696 = vmatprep.mubr.bf16.mxu0 %v1658_v20  ;;  %760 = vmatprep.mubr.bf16.mxu1 %v1660_v21 }
  0x2f   : > { %697 = vmatmul.mubr.bf16.gmra.mrb[4].mxu0 %v1662_v22  ;;  %761 = vmatmul.mubr.bf16.gmra.mrb[4].mxu1 %v1663_v23 }
  0x30   : > { %704 = vmatprep.mubr.bf16.mxu0 %v1664_v24  ;;  %768 = vmatprep.mubr.bf16.mxu1 %v1666_v25 }
  0x37   : > { %705 = vmatmul.mubr.bf16.gmra.mrb[8].mxu0 %v1668_v26  ;;  %769 = vmatmul.mubr.bf16.gmra.mrb[8].mxu1 %v1669_v27 }
  0x38   : > { %712 = vmatprep.mubr.bf16.mxu0 %v1670_v28  ;;  %776 = vmatprep.mubr.bf16.mxu1 %v1672_v29 }
  0x3f   : > { %713 = vmatmul.mubr.bf16.gmra.mrb[12].mxu0 %v1674_v30  ;;  %777 = vmatmul.mubr.bf16.gmra.mrb[12].mxu1 %v1675_v31 }
  0x40   : > { %720 = vmatprep.mubr.bf16.mxu0 %v1676_v32  ;;  %784 = vmatprep.mubr.bf16.mxu1 %v1678_v33 }
  0x47   : > { %721 = vmatmul.mubr.bf16.gmra.mrb[16].mxu0 %v1680_v34  ;;  %785 = vmatmul.mubr.bf16.gmra.mrb[16].mxu1 %v1681_v35 }
  0x48   : > { %728 = vmatprep.mubr.bf16.mxu0 %v1682_v36  ;;  %792 = vmatprep.mubr.bf16.mxu1 %v1684_v37 }
  0x4f   : > { %729 = vmatmul.mubr.bf16.gmra.mrb[20].mxu0 %v1686_v38  ;;  %793 = vmatmul.mubr.bf16.gmra.mrb[20].mxu1 %v1687_v39 }
  0x50   : > { %736 = vmatprep.mubr.bf16.mxu0 %v1688_v40  ;;  %800 = vmatprep.mubr.bf16.mxu1 %v1690_v41 }
  0x57   : > { %737 = vmatmul.mubr.bf16.gmra.mrb[24].mxu0 %v1692_v42  ;;  %801 = vmatmul.mubr.bf16.gmra.mrb[24].mxu1 %v1693_v43 }
  0x58   : > { %744 = vmatprep.mubr.bf16.mxu0 %v1694_v44  ;;  %808 = vmatprep.mubr.bf16.mxu1 %v1696_v45 }
  0x5f   : > { %745 = vmatmul.mubr.bf16.gmra.mrb[28].mxu0 %v1698_v46  ;;  %809 = vmatmul.mubr.bf16.gmra.mrb[28].mxu1 %v1699_v47 }
  0xfa   : > { %v1500_v48 = vpop.f32.mrb[0].mxu0  ;;  %v1548_v49 = vpop.f32.mrb[0].mxu1 }
  0xfb   : > { %v1501_v50 = vpop.f32.mrb[1].mxu0  ;;  %v1549_v52 = vpop.f32.mrb[1].mxu1 }
  0xfc   : > { %v1502_v53 = vadd.f32 %v1501_v50, %v1500_v48  ;;  %v1550_v54 = vadd.f32 %v1549_v52, %v1548_v49  ;;  %v1503_v55 = vpop.f32.mrb[2].mxu0  ;;  %v1551_v56 = vpop.f32.mrb[2].mxu1 }
  0xfd   : > { %v1504_v57 = vpop.f32.mrb[3].mxu0  ;;  %v1552_v58 = vpop.f32.mrb[3].mxu1 }
  0xfe   : > { %v923_v59 = vadd.f32 %v1502_v53, %v1853_v51  ;;  %v939_v60 = vadd.f32 %v1550_v54, %v1853_v51  ;;  %v1505_v61 = vadd.f32 %v1504_v57, %v1503_v55  ;;  %v1553_v62 = vadd.f32 %v1552_v58, %v1551_v56 }
 0x100   : > { %v924_v63 = vadd.f32 %v1505_v61, %v1853_v51  ;;  %v940_v0 = vadd.f32 %v1553_v62, %v1853_v51  ;;  %v955_v1 = vmax.f32 %v923_v59, 0.0  ;;  %v971_v2 = vmax.f32 %v939_v60, 0.0 }
 0x102   : > { %v956_v3 = vmax.f32 %v924_v63, 0.0  ;;  %v972_v4 = vmax.f32 %v940_v0, 0.0  ;;  %v1506_v5 = vpop.f32.mrb[4].mxu0  ;;  %v1554_v6 = vpop.f32.mrb[4].mxu1 }
 0x103   : > { %v1507_v7 = vpop.f32.mrb[5].mxu0  ;;  %v1555_v8 = vpop.f32.mrb[5].mxu1 }
 0x104   : > { %v1392_v9 = vpack.c.bf16 %v956_v3, %v955_v1  ;;  %v1432_v10 = vpack.c.bf16 %v972_v4, %v971_v2  ;;  %v1508_v11 = vadd.f32 %v1507_v7, %v1506_v5  ;;  %v1556_v12 = vadd.f32 %v1555_v8, %v1554_v6  ;;  %v1509_v13 = vpop.f32.mrb[6].mxu0  ;;  %v1557_v14 = vpop.f32.mrb[6].mxu1 }
 0x105   : > { %v1510_v15 = vpop.f32.mrb[7].mxu0  ;;  %v1558_v16 = vpop.f32.mrb[7].mxu1 }
 0x106   : > { %1393 = vst [vmem:[%s1863_s8] sm:$0xff] %v1392_v9   ;;  %1476 = vst [vmem:[%s1863_s8 + $0x40] sm:$0xff] %v1432_v10   ;;  %v925_v17 = vadd.f32 %v1508_v11, %v1853_v51  ;;  %v941_v18 = vadd.f32 %v1556_v12, %v1853_v51  ;;  %v1511_v19 = vadd.f32 %v1510_v15, %v1509_v13 }
 0x107   : > { %v1559_v20 = vadd.f32 %v1558_v16, %v1557_v14 }
 0x108   : > { %v926_v21 = vadd.f32 %v1511_v19, %v1853_v51  ;;  %v957_v23 = vmax.f32 %v925_v17, 0.0  ;;  %v973_v24 = vmax.f32 %v941_v18, 0.0 }
 0x109   : > { %v942_v22 = vadd.f32 %v1559_v20, %v1853_v51 }
 0x10a   : > { %v958_v25 = vmax.f32 %v926_v21, 0.0  ;;  %v1512_v27 = vpop.f32.mrb[8].mxu0  ;;  %v1560_v28 = vpop.f32.mrb[8].mxu1 }
 0x10b   : > { %v974_v26 = vmax.f32 %v942_v22, 0.0  ;;  %v1513_v29 = vpop.f32.mrb[9].mxu0  ;;  %v1561_v30 = vpop.f32.mrb[9].mxu1 }
 0x10c   : > { %v1397_v31 = vpack.c.bf16 %v958_v25, %v957_v23  ;;  %v1514_v33 = vadd.f32 %v1513_v29, %v1512_v27  ;;  %v1562_v34 = vadd.f32 %v1561_v30, %v1560_v28  ;;  %v1515_v35 = vpop.f32.mrb[10].mxu0  ;;  %v1563_v36 = vpop.f32.mrb[10].mxu1 }
 0x10d   : > { %v1437_v32 = vpack.c.bf16 %v974_v26, %v973_v24  ;;  %v1516_v37 = vpop.f32.mrb[11].mxu0  ;;  %v1564_v38 = vpop.f32.mrb[11].mxu1 }
 0x10e   : > { %1469 = vst [vmem:[%s1863_s8 + $0x8] sm:$0xff] %v1397_v31   ;;  %v927_v39 = vadd.f32 %v1514_v33, %v1853_v51  ;;  %v943_v40 = vadd.f32 %v1562_v34, %v1853_v51  ;;  %v1517_v41 = vadd.f32 %v1516_v37, %v1515_v35  ;;  %v1565_v42 = vadd.f32 %v1564_v38, %v1563_v36 }
 0x10f   : > { %1477 = vst [vmem:[%s1863_s8 + $0x48] sm:$0xff] %v1437_v32  }
 0x110   : > { %v928_v43 = vadd.f32 %v1517_v41, %v1853_v51  ;;  %v944_v44 = vadd.f32 %v1565_v42, %v1853_v51  ;;  %v959_v45 = vmax.f32 %v927_v39, 0.0  ;;  %v975_v46 = vmax.f32 %v943_v40, 0.0 }
 0x112   : > { %v960_v47 = vmax.f32 %v928_v43, 0.0  ;;  %v976_v48 = vmax.f32 %v944_v44, 0.0  ;;  %v1518_v49 = vpop.f32.mrb[12].mxu0  ;;  %v1566_v50 = vpop.f32.mrb[12].mxu1 }
 0x113   : > { %v1519_v52 = vpop.f32.mrb[13].mxu0  ;;  %v1567_v53 = vpop.f32.mrb[13].mxu1 }
 0x114   : > { %v1402_v54 = vpack.c.bf16 %v960_v47, %v959_v45  ;;  %v1442_v55 = vpack.c.bf16 %v976_v48, %v975_v46  ;;  %v1520_v56 = vadd.f32 %v1519_v52, %v1518_v49  ;;  %v1568_v57 = vadd.f32 %v1567_v53, %v1566_v50  ;;  %v1521_v58 = vpop.f32.mrb[14].mxu0  ;;  %v1569_v59 = vpop.f32.mrb[14].mxu1 }
 0x115   : > { %v1522_v60 = vpop.f32.mrb[15].mxu0  ;;  %v1570_v61 = vpop.f32.mrb[15].mxu1 }
 0x116   : > { %1470 = vst [vmem:[%s1863_s8 + $0x10] sm:$0xff] %v1402_v54   ;;  %1478 = vst [vmem:[%s1863_s8 + $0x50] sm:$0xff] %v1442_v55   ;;  %v929_v62 = vadd.f32 %v1520_v56, %v1853_v51  ;;  %v945_v63 = vadd.f32 %v1568_v57, %v1853_v51  ;;  %v1523_v0 = vadd.f32 %v1522_v60, %v1521_v58 }
 0x117   : > { %v1571_v1 = vadd.f32 %v1570_v61, %v1569_v59 }
 0x118   : > { %v930_v2 = vadd.f32 %v1523_v0, %v1853_v51  ;;  %v961_v4 = vmax.f32 %v929_v62, 0.0  ;;  %v977_v5 = vmax.f32 %v945_v63, 0.0 }
 0x119   : > { %v946_v3 = vadd.f32 %v1571_v1, %v1853_v51 }
 0x11a   : > { %v962_v6 = vmax.f32 %v930_v2, 0.0  ;;  %v1524_v8 = vpop.f32.mrb[16].mxu0  ;;  %v1572_v9 = vpop.f32.mrb[16].mxu1 }
 0x11b   : > { %v978_v7 = vmax.f32 %v946_v3, 0.0  ;;  %v1525_v10 = vpop.f32.mrb[17].mxu0  ;;  %v1573_v11 = vpop.f32.mrb[17].mxu1 }
 0x11c   : > { %v1407_v12 = vpack.c.bf16 %v962_v6, %v961_v4  ;;  %v1526_v14 = vadd.f32 %v1525_v10, %v1524_v8  ;;  %v1574_v15 = vadd.f32 %v1573_v11, %v1572_v9  ;;  %v1527_v16 = vpop.f32.mrb[18].mxu0  ;;  %v1575_v17 = vpop.f32.mrb[18].mxu1 }
 0x11d   : > { %v1447_v13 = vpack.c.bf16 %v978_v7, %v977_v5  ;;  %v1528_v18 = vpop.f32.mrb[19].mxu0  ;;  %v1576_v19 = vpop.f32.mrb[19].mxu1 }
 0x11e   : > { %1471 = vst [vmem:[%s1863_s8 + $0x18] sm:$0xff] %v1407_v12   ;;  %v931_v20 = vadd.f32 %v1526_v14, %v1853_v51  ;;  %v947_v21 = vadd.f32 %v1574_v15, %v1853_v51  ;;  %v1529_v22 = vadd.f32 %v1528_v18, %v1527_v16  ;;  %v1577_v23 = vadd.f32 %v1576_v19, %v1575_v17 }
 0x11f   : > { %1479 = vst [vmem:[%s1863_s8 + $0x58] sm:$0xff] %v1447_v13  }
 0x120   : > { %v932_v24 = vadd.f32 %v1529_v22, %v1853_v51  ;;  %v948_v25 = vadd.f32 %v1577_v23, %v1853_v51  ;;  %v963_v26 = vmax.f32 %v931_v20, 0.0  ;;  %v979_v27 = vmax.f32 %v947_v21, 0.0 }
 0x122   : > { %v964_v28 = vmax.f32 %v932_v24, 0.0  ;;  %v980_v29 = vmax.f32 %v948_v25, 0.0  ;;  %v1530_v30 = vpop.f32.mrb[20].mxu0  ;;  %v1578_v31 = vpop.f32.mrb[20].mxu1 }
 0x123   : > { %v1531_v32 = vpop.f32.mrb[21].mxu0  ;;  %v1579_v33 = vpop.f32.mrb[21].mxu1 }
 0x124   : > { %v1412_v34 = vpack.c.bf16 %v964_v28, %v963_v26  ;;  %v1452_v35 = vpack.c.bf16 %v980_v29, %v979_v27  ;;  %v1532_v36 = vadd.f32 %v1531_v32, %v1530_v30  ;;  %v1580_v37 = vadd.f32 %v1579_v33, %v1578_v31  ;;  %v1533_v38 = vpop.f32.mrb[22].mxu0  ;;  %v1581_v39 = vpop.f32.mrb[22].mxu1 }
 0x125   : > { %v1534_v40 = vpop.f32.mrb[23].mxu0  ;;  %v1582_v41 = vpop.f32.mrb[23].mxu1 }
 0x126   : > { %1472 = vst [vmem:[%s1863_s8 + $0x20] sm:$0xff] %v1412_v34   ;;  %1480 = vst [vmem:[%s1863_s8 + $0x60] sm:$0xff] %v1452_v35   ;;  %v933_v42 = vadd.f32 %v1532_v36, %v1853_v51  ;;  %v949_v43 = vadd.f32 %v1580_v37, %v1853_v51  ;;  %v1535_v44 = vadd.f32 %v1534_v40, %v1533_v38 }
 0x127   : > { %v1583_v45 = vadd.f32 %v1582_v41, %v1581_v39 }
 0x128   : > { %v934_v46 = vadd.f32 %v1535_v44, %v1853_v51  ;;  %v965_v48 = vmax.f32 %v933_v42, 0.0  ;;  %v981_v49 = vmax.f32 %v949_v43, 0.0 }
 0x129   : > { %v950_v47 = vadd.f32 %v1583_v45, %v1853_v51 }
 0x12a   : > { %v966_v50 = vmax.f32 %v934_v46, 0.0  ;;  %v1536_v53 = vpop.f32.mrb[24].mxu0  ;;  %v1584_v54 = vpop.f32.mrb[24].mxu1 }
 0x12b   : > { %v982_v52 = vmax.f32 %v950_v47, 0.0  ;;  %v1537_v55 = vpop.f32.mrb[25].mxu0  ;;  %v1585_v56 = vpop.f32.mrb[25].mxu1 }
 0x12c   : > { %v1417_v57 = vpack.c.bf16 %v966_v50, %v965_v48  ;;  %v1538_v59 = vadd.f32 %v1537_v55, %v1536_v53  ;;  %v1586_v60 = vadd.f32 %v1585_v56, %v1584_v54  ;;  %v1539_v61 = vpop.f32.mrb[26].mxu0  ;;  %v1587_v62 = vpop.f32.mrb[26].mxu1 }
 0x12d   : > { %v1457_v58 = vpack.c.bf16 %v982_v52, %v981_v49  ;;  %v1540_v63 = vpop.f32.mrb[27].mxu0  ;;  %v1588_v0 = vpop.f32.mrb[27].mxu1 }
 0x12e   : > { %1473 = vst [vmem:[%s1863_s8 + $0x28] sm:$0xff] %v1417_v57   ;;  %v935_v1 = vadd.f32 %v1538_v59, %v1853_v51  ;;  %v951_v2 = vadd.f32 %v1586_v60, %v1853_v51  ;;  %v1541_v3 = vadd.f32 %v1540_v63, %v1539_v61  ;;  %v1589_v4 = vadd.f32 %v1588_v0, %v1587_v62 }
 0x12f   : > { %1481 = vst [vmem:[%s1863_s8 + $0x68] sm:$0xff] %v1457_v58  }
 0x130   : > { %v936_v5 = vadd.f32 %v1541_v3, %v1853_v51  ;;  %v952_v6 = vadd.f32 %v1589_v4, %v1853_v51  ;;  %v967_v7 = vmax.f32 %v935_v1, 0.0  ;;  %v983_v8 = vmax.f32 %v951_v2, 0.0 }
 0x132   : > { %v968_v9 = vmax.f32 %v936_v5, 0.0  ;;  %v984_v10 = vmax.f32 %v952_v6, 0.0  ;;  %v1542_v11 = vpop.f32.mrb[28].mxu0  ;;  %v1590_v12 = vpop.f32.mrb[28].mxu1 }
 0x133   : > { %v1543_v13 = vpop.f32.mrb[29].mxu0  ;;  %v1591_v14 = vpop.f32.mrb[29].mxu1 }
 0x134   : > { %v1422_v15 = vpack.c.bf16 %v968_v9, %v967_v7  ;;  %v1462_v16 = vpack.c.bf16 %v984_v10, %v983_v8  ;;  %v1544_v17 = vadd.f32 %v1543_v13, %v1542_v11  ;;  %v1592_v18 = vadd.f32 %v1591_v14, %v1590_v12  ;;  %v1545_v19 = vpop.f32.mrb[30].mxu0  ;;  %v1593_v20 = vpop.f32.mrb[30].mxu1 }
 0x135   : > { %v1546_v21 = vpop.f32.mrb[31].mxu0  ;;  %v1594_v22 = vpop.f32.mrb[31].mxu1 }
 0x136   : > { %1474 = vst [vmem:[%s1863_s8 + $0x30] sm:$0xff] %v1422_v15   ;;  %1482 = vst [vmem:[%s1863_s8 + $0x70] sm:$0xff] %v1462_v16   ;;  %v937_v23 = vadd.f32 %v1544_v17, %v1853_v51  ;;  %v953_v24 = vadd.f32 %v1592_v18, %v1853_v51  ;;  %v1547_v25 = vadd.f32 %v1546_v21, %v1545_v19 }
 0x137   : > { %v1595_v26 = vadd.f32 %v1594_v22, %v1593_v20 }
 0x138   : > { %v938_v27 = vadd.f32 %v1547_v25, %v1853_v51  ;;  %v969_v29 = vmax.f32 %v937_v23, 0.0  ;;  %v985_v30 = vmax.f32 %v953_v24, 0.0 }
 0x139   : > { %v954_v28 = vadd.f32 %v1595_v26, %v1853_v51 }
 0x13a   : > { %v970_v31 = vmax.f32 %v938_v27, 0.0 }
 0x13b   : > { %v986_v32 = vmax.f32 %v954_v28, 0.0 }
 0x13c   : > { %v1427_v33 = vpack.c.bf16 %v970_v31, %v969_v29 }
 0x13d   : > { %v1467_v34 = vpack.c.bf16 %v986_v32, %v985_v30 }
 0x13e   : > { %1475 = vst [vmem:[%s1863_s8 + $0x38] sm:$0xff] %v1427_v33  }
 0x13f   : > { %1483 = vst [vmem:[%s1863_s8 + $0x78] sm:$0xff] %v1467_v34  }
 0x140 PF: > { %s13_s14 = sadd.s32 1, %s1722_s14   ;;  %s1922_s12 = smov %s1718_s13 }
 0x141   : > { %p10_p5 = scmp.ge.s32.totalorder %s13_s14, 10   ;;  %s1923_s13 = smov %s1925_s15 }
 0x143   :  { %12 = sbr.rel (!%p10_p5) target bundleno = 2 (0x2), region = 76 }

</bundles_post_ra>
